<compile_context>
chip_gen: v7x
topology: tpu7x:2x2x1
jax: 0.10.0
libtpu: 0.0.40
codegen_flags: <defaults>
</compile_context>

<pallas_src>
import functools

import jax
import jax.numpy as jnp
from jax.experimental import pallas as pl
from jax.experimental.pallas import tpu as pltpu


def _standardize_kernel(x_ref, o_ref, *, mean, std):
    # Pure elementwise VPU work on one lane-dense (B, tn) tile.
    o_ref[...] = (x_ref[...] - mean) / std


def standardize(signal, mean, std):
    """Pallas forward of Standardize: (signal - mean) / std.

    signal: (..., N) float array (e.g. a batch of ECG traces).
    mean, std: python int/float scalars (module hyper-parameters).
    """
    if not isinstance(mean, (int, float)):
        raise ValueError("mean must be a int or float")
    if not isinstance(std, (int, float)):
        raise ValueError("std must be a int or float")

    orig_shape = signal.shape
    orig_dtype = signal.dtype

    x = jnp.asarray(signal, dtype=jnp.float32)
    if x.ndim == 1:
        x = x.reshape(1, -1)
    else:
        x = x.reshape(-1, orig_shape[-1])
    b, n = x.shape

    # Tile the trace axis with the biggest clean multiple-of-128 tile
    # (large, lane-dense blocks sit near the HBM roofline); fall back to the
    # full axis when it does not divide evenly (full-dim blocks are always
    # legal regardless of the (8, 128) constraint).
    tn = n
    for cand in (4096, 2048, 1024, 512, 256, 128):
        if n >= cand and n % cand == 0:
            tn = cand
            break

    grid = (n // tn,)

    out = pl.pallas_call(
        functools.partial(_standardize_kernel, mean=float(mean), std=float(std)),
        out_shape=jax.ShapeDtypeStruct((b, n), jnp.float32),
        grid=grid,
        in_specs=[pl.BlockSpec((b, tn), lambda j: (0, j))],
        out_specs=pl.BlockSpec((b, tn), lambda j: (0, j)),
        compiler_params=pltpu.CompilerParams(
            dimension_semantics=("parallel",),
        ),
    )(x)

    return out.reshape(orig_shape).astype(orig_dtype)


if __name__ == "__main__":
    key = jax.random.PRNGKey(0)

    # Module params (deterministic, in-script).
    mean = 0.5
    std = 2.0

    # Small batch of ECG-like traces: batch=4, N=512 samples @ 500 Hz.
    B, N = 4, 512
    signal_freq = 500.0
    t = jnp.arange(N, dtype=jnp.float32) / signal_freq
    base = jnp.sin(2.0 * jnp.pi * 1.2 * t)[None, :]
    noise = 0.1 * jax.random.normal(key, (B, N), dtype=jnp.float32)
    signal = (base + noise).astype(jnp.float32)

    out = standardize(signal, mean, std)
    jax.block_until_ready(out)

    # Reference check (plain JAX).
    ref = (signal - mean) / std
    assert out.shape == signal.shape
    assert jnp.allclose(out, ref, atol=1e-6, rtol=1e-6), "mismatch vs reference"

    print("KERNEL_OK")
</pallas_src>

<mosaic_0001>
module attributes {stable_mosaic.version = 11 : i64} {
  func.func @_standardize_kernel(%arg0: i32, %arg1: memref<4x512xf32, #tpu.memory_space<vmem>>, %arg2: memref<4x512xf32, #tpu.memory_space<vmem>>) attributes {dimension_semantics = [#tpu.dimension_semantics<parallel>], iteration_bounds = array<i64: 1>, scalar_prefetch = 0 : i64, scratch_operands = 0 : i64, tpu.core_type = #tpu.core_type<tc>, window_params = [{transform_indices = @transform_0, window_bounds = array<i64: 4, 512>}, {transform_indices = @transform_1, window_bounds = array<i64: 4, 512>}]} {
    %c0 = arith.constant 0 : index
    %c0_0 = arith.constant 0 : index
    %0 = vector.load %arg1[%c0, %c0_0] : memref<4x512xf32, #tpu.memory_space<vmem>>, vector<4x512xf32>
    %cst = arith.constant 5.000000e-01 : f32
    %1 = vector.broadcast %cst : f32 to vector<4x512xf32>
    %2 = arith.subf %0, %1 : vector<4x512xf32>
    %cst_1 = arith.constant 2.000000e+00 : f32
    %3 = vector.broadcast %cst_1 : f32 to vector<4x512xf32>
    %4 = arith.divf %2, %3 : vector<4x512xf32>
    %c0_2 = arith.constant 0 : index
    %c0_3 = arith.constant 0 : index
    %5 = vector.load %arg2[%c0_2, %c0_3] : memref<4x512xf32, #tpu.memory_space<vmem>>, vector<4x512xf32>
    tpu.vector_store %arg2[%c0_2, %c0_3], %4 {strides = array<i32>} : memref<4x512xf32, #tpu.memory_space<vmem>>, vector<4x512xf32>,
    return
  }
  func.func @transform_0(%arg0: i32) -> (i32, i32) {
    %c0_i32 = arith.constant 0 : i32
    %c0_i32_0 = arith.constant 0 : i32
    return %c0_i32, %arg0 : i32, i32
  }
  func.func @transform_1(%arg0: i32) -> (i32, i32) {
    %c0_i32 = arith.constant 0 : i32
    %c0_i32_0 = arith.constant 0 : i32
    return %c0_i32, %arg0 : i32, i32
  }
}

</mosaic_0001>

<bundles_post_ra>
// kernel: tpu_custom_call.1
= control target key start
LH: loop header
LB: loop body
LE: loop exit
PB: predicated region body
PF: predicated region fallthrough
CT: control target
= control target key end

     0   :  { %6 = vsyncpa [#allocation3], 0  ;;  %s133_s0 = inlined_call_operand.hbm [shape: f32[4,512], index: 0, kind: input, shape index: {}]   ;;  %s134_s1 = inlined_call_operand.hbm [shape: f32[4,512], index: 1, kind: output, shape index: {}]  }
   0x1   :  { %7 = vsyncpa [#allocation4], 0  ;;  %s97_s6 = smov [#allocation2]   ;;  %s49_s10 = scalar_lea.hbm %s133_s0, 256 }
   0x2   :  { %s14_s7 = sshll.u32 %s97_s6, 4  ;;  %p50_p0 = scmp.ne.s32.totalorder %s133_s0, %s49_s10  ;;  %s15_s7 = int_to_ptr.vmem [resolvable:$true] %s14_s7 }
   0x3   :  { %p53_p1 = scmp.lt.u32.totalorder %s49_s10, %s133_s0 }
   0x5   :  { %p55_p2 = pnand %p53_p1, %p50_p0 }
   0x7   :  { %58 = shalt.err (!%p55_p2)
}
   0x8   :  { %s59_s15 = scalar_lea.vmem %s15_s7, 256  ;;  %p64_p4 = scmp.lt.s32.totalorder %s15_s7, %s15_s7 }
   0x9   :  { %p60_p3 = scmp.ne.s32.totalorder %s15_s7, %s59_s15  ;;  %p65_p5 = scmp.lt.s32.totalorder %s59_s15, %s59_s15 }
   0xb   :  { %p66_p6 = por %p65_p5, %p64_p4 }
   0xd   :  { %p67_p7 = pnand %p66_p6, %p60_p3 }
   0xf   :  { %70 = shalt.err (!%p67_p7)
}
  0x10   :  { %17 = dma.hbm_to_vmem [thread:$0]  %s133_s0, 256, %s15_s7, [#allocation3]  }
  0x11   :  { %93 = dma.done.wait [#allocation3], 256  }
  0x12   :  { %94 = vsyncadd [#allocation3], 4294967040  ;;  %v21_v0 = vld [vmem:[#allocation2] sm:$0xff]  ;;  %v22_v1 = vld [vmem:[#allocation2 + $0x8] sm:$0xff]  ;;  %s98_s18 = smov [#allocation5]  }
  0x13   :  { %s36_s19 = sshll.u32 %s98_s18, 4  ;;  %v45_v2 = vadd.f32 -0.5, %v21_v0  ;;  %v46_v3 = vadd.f32 -0.5, %v22_v1  ;;  %s37_s19 = int_to_ptr.vmem [resolvable:$true] %s36_s19 }
  0x14   :  { %s71_s20 = scalar_lea.vmem %s37_s19, 256  ;;  %p76_p9 = scmp.lt.s32.totalorder %s37_s19, %s37_s19 }
  0x15   :  { %v26_v4 = vmul.f32 0.5, %v45_v2  ;;  %v27_v5 = vmul.f32 0.5, %v46_v3  ;;  %p72_p8 = scmp.ne.s32.totalorder %s37_s19, %s71_s20  ;;  %p77_p10 = scmp.lt.s32.totalorder %s71_s20, %s71_s20 }
  0x17   :  { %28 = vst [vmem:[#allocation5] sm:$0xff] %v26_v4  ;;  %29 = vst [vmem:[#allocation5 + $0x8] sm:$0xff] %v27_v5  ;;  %p78_p11 = por %p77_p10, %p76_p9 }
  0x19   :  { %p79_p12 = pnand %p78_p11, %p72_p8 }
  0x1b   :  { %82 = shalt.err (!%p79_p12)
}
  0x1c   :  { %s83_s22 = scalar_lea.hbm %s134_s1, 256 }
  0x1d   :  { %p84_p13 = scmp.ne.s32.totalorder %s134_s1, %s83_s22  ;;  %p87_p0 = scmp.lt.u32.totalorder %s83_s22, %s134_s1 }
  0x1f   :  { %p89_p1 = pnand %p87_p0, %p84_p13 }
  0x21   :  { %92 = shalt.err (!%p89_p1)
}
  0x22   :  { %39 = dma.vmem_to_hbm [thread:$0]  %s37_s19, 256, %s134_s1, [#allocation4]  }
  0x23   :  { %95 = dma.done.wait [#allocation4], 256  }
  0x24   :  { %96 = vsyncadd [#allocation4], 4294967040 }
  0x25   :  { %43 = vsyncpa [#allocation3], 1 }
  0x26   :  { %44 = vsyncpa [#allocation4], 1 }

</bundles_post_ra>
